<compile_context>
chip_gen: v7x
topology: tpu7x:2x2x1
jax: 0.10.0
libtpu: 0.0.40
codegen_flags: <defaults>
</compile_context>

<pallas_src>
import jax
import jax.numpy as jnp
from jax.experimental import pallas as pl
from jax.experimental.pallas import tpu as pltpu


def fused_concat_linear_kernel(x_ref, w_ref, b_ref, o_ref):
    # x_ref: (TB, F_in)   w_ref: (F_in, L*F_out)   b_ref: (1, L*F_out)
    # o_ref: (TB, L*F_out) — the full concatenated slab for this batch tile.
    y = jnp.dot(x_ref[...], w_ref[...], preferred_element_type=jnp.float32)
    o_ref[...] = (y + b_ref[...]).astype(o_ref.dtype)


def concat_layer_forward(x, w_stack, b_stack, *, tb=None):
    """Fused ConcatLayer([Linear]*L, dim=1) forward.

    x:        [B, F_in]
    w_stack:  [L, F_in, F_out]   (per-layer weights, already x @ W layout)
    b_stack:  [L, F_out]
    returns:  [B, L * F_out]     == concat([x @ W_i + b_i for i], axis=1)
    """
    B, F_in = x.shape
    L, _, F_out = w_stack.shape
    N = L * F_out

    # Fuse the concat into the parameters (static, one-time transform):
    # W_fused[:, i*F_out:(i+1)*F_out] == w_stack[i].
    w_fused = jnp.transpose(w_stack, (1, 0, 2)).reshape(F_in, N)
    b_fused = b_stack.reshape(1, N)

    # Batch tile: single invocation for small B; for large B tile in multiples
    # of 8 (f32 sublane), capped at 4096 rows to stay inside v7x's scoped VMEM
    # budget (2 bufs x (TB*F_in + TB*N)*4 B + weights).
    if tb is None:
        tb = B if B <= 4096 else 4096
    grid = (pl.cdiv(B, tb),)

    cost = pl.CostEstimate(
        flops=2 * B * F_in * N,
        transcendentals=0,
        bytes_accessed=(B * F_in + F_in * N + N + B * N) * x.dtype.itemsize,
    )

    return pl.pallas_call(
        fused_concat_linear_kernel,
        out_shape=jax.ShapeDtypeStruct((B, N), x.dtype),
        grid_spec=pltpu.PrefetchScalarGridSpec(
            num_scalar_prefetch=0,
            grid=grid,
            in_specs=[
                pl.BlockSpec((tb, F_in), lambda i: (i, 0)),  # batch tile of x
                pl.BlockSpec((F_in, N), lambda i: (0, 0)),   # fused weights (resident)
                pl.BlockSpec((1, N), lambda i: (0, 0)),      # fused bias (resident)
            ],
            # Lane-dense concatenated output slab (N = 384, multiple of 128).
            out_specs=pl.BlockSpec((tb, N), lambda i: (i, 0)),
        ),
        compiler_params=pltpu.CompilerParams(
            dimension_semantics=("parallel",),
        ),
        cost_estimate=cost,
    )(x, w_fused, b_fused)


if __name__ == "__main__":
    # Shapes consistent with the forward: batch=8, hidden=32, three
    # Linear(32, 128) sub-layers concatenated along dim=1 -> [8, 384].
    B, F_IN, F_OUT, L = 8, 32, 128, 3

    key = jax.random.PRNGKey(0)
    kx, kw, kb = jax.random.split(key, 3)

    x = jax.random.normal(kx, (B, F_IN), dtype=jnp.float32)
    # Deterministic synthetic parameters (no checkpoint load).
    w_stack = jax.random.normal(kw, (L, F_IN, F_OUT), dtype=jnp.float32) * 0.05
    b_stack = jax.random.normal(kb, (L, F_OUT), dtype=jnp.float32) * 0.01

    out = concat_layer_forward(x, w_stack, b_stack)
    out = jax.block_until_ready(out)

    # Pure-JAX reference: ConcatLayer forward semantics.
    ref = jnp.concatenate(
        [x @ w_stack[i] + b_stack[i] for i in range(L)], axis=1
    )

    assert out.shape == (B, L * F_OUT), out.shape
    assert out.dtype == x.dtype
    assert jnp.allclose(out, ref, atol=1e-5, rtol=1e-5), "mismatch vs reference"

    print("KERNEL_OK")
</pallas_src>

<mosaic_0001>
module attributes {stable_mosaic.version = 11 : i64} {
  func.func @fused_concat_linear_kernel(%arg0: i32, %arg1: memref<8x32xf32, #tpu.memory_space<vmem>>, %arg2: memref<32x384xf32, #tpu.memory_space<vmem>>, %arg3: memref<1x384xf32, #tpu.memory_space<vmem>>, %arg4: memref<8x384xf32, #tpu.memory_space<vmem>>) attributes {dimension_semantics = [#tpu.dimension_semantics<parallel>], iteration_bounds = array<i64: 1>, scalar_prefetch = 0 : i64, scratch_operands = 0 : i64, tpu.core_type = #tpu.core_type<tc>, window_params = [{transform_indices = @transform_0, window_bounds = array<i64: 8, 32>}, {pipeline_mode = #tpu.pipeline_mode<synchronous>, transform_indices = @transform_1, window_bounds = array<i64: 32, 384>}, {pipeline_mode = #tpu.pipeline_mode<synchronous>, transform_indices = @transform_2, window_bounds = array<i64: 1, 384>}, {transform_indices = @transform_3, window_bounds = array<i64: 8, 384>}]} {
    %c0 = arith.constant 0 : index
    %c0_0 = arith.constant 0 : index
    %0 = vector.load %arg1[%c0, %c0_0] : memref<8x32xf32, #tpu.memory_space<vmem>>, vector<8x32xf32>
    %c0_1 = arith.constant 0 : index
    %c0_2 = arith.constant 0 : index
    %1 = vector.load %arg2[%c0_1, %c0_2] : memref<32x384xf32, #tpu.memory_space<vmem>>, vector<32x384xf32>
    %cst = arith.constant dense<0.000000e+00> : vector<8x384xf32>
    %2 = tpu.matmul %0, %1, %cst {dimension_numbers = #tpu.dot_dimension_numbers<[1], [0], [0], [1], [0, 0, 1, 1], [], []>} : vector<8x32xf32>, vector<32x384xf32>, vector<8x384xf32> -> vector<8x384xf32>
    %c0_3 = arith.constant 0 : index
    %c0_4 = arith.constant 0 : index
    %3 = vector.load %arg3[%c0_3, %c0_4] : memref<1x384xf32, #tpu.memory_space<vmem>>, vector<1x384xf32>
    %4 = vector.broadcast %3 : vector<1x384xf32> to vector<8x384xf32>
    %5 = arith.addf %2, %4 : vector<8x384xf32>
    %c0_5 = arith.constant 0 : index
    %c0_6 = arith.constant 0 : index
    %6 = vector.load %arg4[%c0_5, %c0_6] : memref<8x384xf32, #tpu.memory_space<vmem>>, vector<8x384xf32>
    tpu.vector_store %arg4[%c0_5, %c0_6], %5 {strides = array<i32>} : memref<8x384xf32, #tpu.memory_space<vmem>>, vector<8x384xf32>,
    return
  }
  func.func @transform_0(%arg0: i32) -> (i32, i32) {
    %c0_i32 = arith.constant 0 : i32
    %c0_i32_0 = arith.constant 0 : i32
    return %arg0, %c0_i32 : i32, i32
  }
  func.func @transform_1(%arg0: i32) -> (i32, i32) {
    %c0_i32 = arith.constant 0 : i32
    %c0_i32_0 = arith.constant 0 : i32
    %c0_i32_1 = arith.constant 0 : i32
    return %c0_i32, %c0_i32_0 : i32, i32
  }
  func.func @transform_2(%arg0: i32) -> (i32, i32) {
    %c0_i32 = arith.constant 0 : i32
    %c0_i32_0 = arith.constant 0 : i32
    %c0_i32_1 = arith.constant 0 : i32
    return %c0_i32, %c0_i32_0 : i32, i32
  }
  func.func @transform_3(%arg0: i32) -> (i32, i32) {
    %c0_i32 = arith.constant 0 : i32
    %c0_i32_0 = arith.constant 0 : i32
    return %arg0, %c0_i32 : i32, i32
  }
}

</mosaic_0001>

<bundles_post_ra>
// kernel: tpu_custom_call.1
= control target key start
LH: loop header
LB: loop body
LE: loop exit
PB: predicated region body
PF: predicated region fallthrough
CT: control target
= control target key end

     0   :  { %8 = vsyncpa [#allocation3], 0  ;;  %s421_s0 = inlined_call_operand.hbm [shape: f32[8,32], index: 0, kind: input, shape index: {}]   ;;  %s422_s1 = inlined_call_operand.hbm [shape: f32[32,384], index: 1, kind: input, shape index: {}]   ;;  %s423_s2 = inlined_call_operand.vmem [shape: f32[1,384], index: 2, kind: input, shape index: {}]   ;;  %s424_s3 = inlined_call_operand.hbm [shape: f32[8,384], index: 3, kind: output, shape index: {}]  }
   0x1   :  { %9 = vsyncpa [#allocation6], 0 }
   0x2   :  { %10 = vsyncpa [#allocation4], 0  ;;  %s347_s12 = smov [#allocation2]   ;;  %s348_s14 = smov [#allocation5]  }
   0x3   :  { %s17_s13 = sshll.u32 %s347_s12, 4  ;;  %s26_s15 = sshll.u32 %s348_s14, 4  ;;  %s18_s13 = int_to_ptr.vmem [resolvable:$true] %s17_s13  ;;  %s375_s15 = int_to_ptr.vmem [resolvable:$true] %s26_s15 }
   0x4   :  { %s275_s18 = scalar_lea.hbm %s421_s0, 128 }
   0x5   :  { %p276_p0 = scmp.ne.s32.totalorder %s421_s0, %s275_s18  ;;  %p279_p1 = scmp.lt.u32.totalorder %s275_s18, %s421_s0 }
   0x7   :  { %p281_p2 = pnand %p279_p1, %p276_p0 }
   0x9   :  { %284 = shalt.err (!%p281_p2)
}
   0xa   :  { %s285_s23 = scalar_lea.vmem %s18_s13, 128  ;;  %p290_p4 = scmp.lt.s32.totalorder %s18_s13, %s18_s13 }
   0xb   :  { %p286_p3 = scmp.ne.s32.totalorder %s18_s13, %s285_s23  ;;  %p291_p5 = scmp.lt.s32.totalorder %s285_s23, %s285_s23 }
   0xd   :  { %p292_p6 = por %p291_p5, %p290_p4 }
   0xf   :  { %p293_p7 = pnand %p292_p6, %p286_p3 }
  0x11   :  { %296 = shalt.err (!%p293_p7)
}
  0x12   :  { %20 = dma.hbm_to_vmem [thread:$0]  %s421_s0, 128, %s18_s13, [#allocation3]  }
  0x13   :  { %s297_s28 = scalar_lea.hbm %s422_s1, 1536 }
  0x14   :  { %p298_p8 = scmp.ne.s32.totalorder %s422_s1, %s297_s28  ;;  %p301_p9 = scmp.lt.u32.totalorder %s297_s28, %s422_s1 }
  0x16   :  { %p303_p10 = pnand %p301_p9, %p298_p8 }
  0x18   :  { %306 = shalt.err (!%p303_p10)
}
  0x19   :  { %s307_s6 = scalar_lea.vmem %s375_s15, 1536  ;;  %p312_p12 = scmp.lt.s32.totalorder %s375_s15, %s375_s15 }
  0x1a   :  { %p308_p11 = scmp.ne.s32.totalorder %s375_s15, %s307_s6  ;;  %p313_p13 = scmp.lt.s32.totalorder %s307_s6, %s307_s6 }
  0x1c   :  { %p314_p0 = por %p313_p13, %p312_p12 }
  0x1e   :  { %p315_p1 = pnand %p314_p0, %p308_p11 }
  0x20   :  { %318 = shalt.err (!%p315_p1)
}
  0x21   :  { %s349_s0 = smov 384   ;;  %s350_s7 = smov 24  }
  0x22   :  { %32 = dma.hbm_to_vmem [thread:$0]  %s422_s1, 1536, %s375_s15, [#allocation6], %s349_s0, %s349_s0, %s350_s7  }
  0x23   :  { %341 = dma.done.wait [#allocation3], 128  }
  0x24   :  { %342 = vsyncadd [#allocation3], 4294967168 }
  0x25   :  { %343 = dma.done.wait [#allocation6], 1536  }
  0x26   :  { %344 = vsyncadd [#allocation6], 4294965760  ;;  %v351_v0 = vmov 0.0|0.0   ;;  %v352_v1 = vmov 0.0   ;;  %vm353_vm0 = vmmov 0   ;;  %v43_v2 = vld [vmem:[#allocation5 + $0x8] sm:$0xff]  ;;  %v56_v21 = vlaneseq }
  0x27   :  { %261 = vmatprep.subr.bf16.mxu1 %v351_v0  ;;  %139 = vmatprep.mubr.f32.mxu0 %v352_v1  ;;  %v46_v3 = vld [vmem:[#allocation5 + $0x20] sm:$0xff]  ;;  %v45_v6 = vld [vmem:[#allocation5 + $0x18] sm:$0xff]  ;;  %v44_v7 = vld [vmem:[#allocation5 + $0x10] sm:$0xff]  ;;  %vm71_vm1 = vcmask 261120   ;;  %s354_s11 = smov [#allocation7]  }
  0x28   :  { %250 = vmatprep.mubr.msk.f32.mxu1 %vm353_vm0, %v352_v1  ;;  %v42_v4 = vld [vmem:[#allocation5] sm:$0xff]  ;;  %v253_v5 = vpack.c.bf16 %v46_v3, %v43_v2  ;;  %v47_v8 = vld [vmem:[#allocation5 + $0x28] sm:$0xff]  ;;  %v49_v11 = vld [vmem:[#allocation5 + $0x38] sm:$0xff]  ;;  %v57_v22 = vshrl.u32 %v56_v21, 7  ;;  %s225_s12 = sshll.u32 %s354_s11, 4  ;;  %s226_s12 = int_to_ptr.vmem [resolvable:$true] %s225_s12 }
  0x29   :  { %v255_v9 = vpack.c.bf16 %v45_v6, %v42_v4  ;;  %v262_v10 = vpack.c.bf16 %v47_v8, %v44_v7  ;;  %v52_v12 = vld [vmem:[#allocation5 + $0x50] sm:$0xff]  ;;  %v51_v15 = vld [vmem:[#allocation5 + $0x48] sm:$0xff]  ;;  %v50_v16 = vld [vmem:[#allocation5 + $0x40] sm:$0xff]  ;;  %s319_s13 = scalar_lea.vmem %s226_s12, 384  ;;  %p324_p3 = scmp.lt.s32.totalorder %s226_s12, %s226_s12 }
  0x2a   :  { %v48_v13 = vld [vmem:[#allocation5 + $0x30] sm:$0xff]  ;;  %254 = vmatprep.subr.bf16.mxu0 %v253_v5  ;;  %v257_v14 = vpack.c.bf16 %v52_v12, %v49_v11  ;;  %v53_v17 = vld [vmem:[#allocation5 + $0x58] sm:$0xff]  ;;  %v58_v23 = vsub.s32 0, %v57_v22  ;;  %v66_v24 = vsub.s32 2, %v57_v22  ;;  %v62_v26 = vsub.s32 1, %v57_v22  ;;  %p320_p2 = scmp.ne.s32.totalorder %s226_s12, %s319_s13  ;;  %p325_p4 = scmp.lt.s32.totalorder %s319_s13, %s319_s13 }
  0x2b   :  { %256 = vmatpush1.bf16.msra.mxu0 %v255_v9  ;;  %263 = vmatpush3.bf16.msra.mxu1 %v262_v10  ;;  %v259_v18 = vpack.c.bf16 %v51_v15, %v48_v13  ;;  %v265_v19 = vpack.c.bf16 %v53_v17, %v50_v16  ;;  %v41_v20 = vld [vmem:[#allocation2] sm:$0xff] }
  0x2c   :  { %258 = vmatprep.subr.bf16.mxu0 %v257_v14  ;;  %264 = vmatprep.subr.bf16.mxu1 %v351_v0  ;;  %v54_v25 = vld [vmem:[%s423_s2] sm:$0x7]  ;;  %p326_p5 = por %p325_p4, %p324_p3 }
  0x2d   :  { %v59_v27 = vrot.slane %v54_v25, %v58_v23  ;;  %v67_v28 = vrot.slane %v54_v25, %v66_v24  ;;  %v63_v29 = vrot.slane %v54_v25, %v62_v26 }
  0x2e   :  { %p327_p6 = pnand %p326_p5, %p320_p2 }
  0x2f   :  { %260 = vmatpush1.bf16.msra.mxu0 %v259_v18  ;;  %266 = vmatpush3.bf16.msra.mxu1 %v265_v19 }
  0x32   :  { %235 = vmatmul.mubr.msk.f32.vlgmr.msra.gmra.mrb[0].mxu0 %vm71_vm1, %v41_v20  ;;  %251 = vmatmul.mubr.msk.f32.vlgmr.msra.gmra.mrb[0].mxu1 %vm71_vm1, %v41_v20 }
 0x105   :  { %v141_v30 = vpop.f32.mrb[0].mxu0  ;;  %v212_v31 = vpop.f32.mrb[0].mxu1 }
 0x106   :  { %v142_v32 = vadd.f32 %v141_v30, %v59_v27  ;;  %v213_v33 = vadd.f32 %v212_v31, %v67_v28  ;;  %v143_v34 = vpop.f32.mrb[1].mxu0  ;;  %v252_v35 = vpop.f32.mrb[1].mxu1 }
 0x107   :  { %v144_v36 = vadd.f32 %v143_v34, %v63_v29 }
 0x108   :  { %216 = vst [vmem:[#allocation7] sm:$0xff] %v142_v32  ;;  %218 = vst [vmem:[#allocation7 + $0x10] sm:$0xff] %v213_v33 }
 0x109   :  { %217 = vst [vmem:[#allocation7 + $0x8] sm:$0xff] %v144_v36 }
 0x10a   :  { %330 = shalt.err (!%p327_p6)
}
 0x10b   :  { %s331_s15 = scalar_lea.hbm %s424_s3, 384 }
 0x10c   :  { %p332_p7 = scmp.ne.s32.totalorder %s424_s3, %s331_s15  ;;  %p335_p8 = scmp.lt.u32.totalorder %s331_s15, %s424_s3 }
 0x10e   :  { %p337_p9 = pnand %p335_p8, %p332_p7 }
 0x110   :  { %340 = shalt.err (!%p337_p9)
}
 0x111   :  { %228 = dma.vmem_to_hbm [thread:$0]  %s226_s12, 384, %s424_s3, [#allocation4]  }
 0x112   :  { %345 = dma.done.wait [#allocation4], 384  }
 0x113   :  { %346 = vsyncadd [#allocation4], 4294966912 }
 0x114   :  { %232 = vsyncpa [#allocation3], 1 }
 0x115   :  { %233 = vsyncpa [#allocation6], 1 }
 0x116   :  { %234 = vsyncpa [#allocation4], 1 }

</bundles_post_ra>
